<compile_context>
chip_gen: v7x
topology: tpu7x:2x2x1
jax: 0.10.0
libtpu: 0.0.40
codegen_flags: <defaults>
</compile_context>

<pallas_src>
import math

import jax
import jax.numpy as jnp
from jax import lax
from jax.experimental import pallas as pl
from jax.experimental.pallas import tpu as pltpu


def calculate_theta2(d):
    """Closed-form Bernstein-basis coefficients (matches the sympy/scipy code)."""
    thetas = []
    for i in range(d + 1):
        coeffs = [0.0] * (d + 1)
        inv_beta = (d + 1) * math.comb(d, i)  # 1 / Beta(i+1, d+1-i)
        for j in range(d - i + 1):
            k = i + j
            coeffs[k] = inv_beta * math.comb(d - i, j) * ((-1.0) ** j) / (2.0 ** k)
        thetas.append(coeffs)
    return thetas


# ---------------------------------------------------------------------------
# VMEM budgeting helpers (lane-padded footprints; H=32 pads to 128 lanes)
# ---------------------------------------------------------------------------
def _padded_bytes(shape, itemsize):
    r = shape[-2] if len(shape) >= 2 else 1
    c = shape[-1]
    r_pad = -(-r // 8) * 8
    c_pad = -(-c // 128) * 128
    lead = 1
    for dd in shape[:-2]:
        lead *= dd
    return lead * r_pad * c_pad * itemsize


def _vmem_budget_bytes():
    """~75% of physical VMEM; 64 MiB (v7x) fallback if the query fails."""
    cap = 64 * 1024 * 1024
    try:
        info = pltpu.get_tpu_info()
        cap = int(getattr(info, "vmem_capacity_bytes", cap))
    except Exception:
        pass
    return (3 * cap) // 4


# ---------------------------------------------------------------------------
# Kernels
# ---------------------------------------------------------------------------
def _make_resident_kernel(H, cdt):
    """Ahat fully VMEM-resident. grid = (K-1,). Output block is the accumulator."""
    use_mirror = cdt != jnp.float32

    if use_mirror:
        def kernel(feat0_ref, feat0c_ref, acc0_ref, ahat_ref, wrest_ref,
                   out_ref, feat_f, feat_c):
            s = pl.program_id(0)

            @pl.when(s == 0)
            def _init():
                out_ref[...] = acc0_ref[...]      # acc0 already contains b2
                feat_f[...] = feat0_ref[...]      # f32 recurrence state
                feat_c[...] = feat0c_ref[...]     # compute-dtype mirror

            new_feat = feat_f[...] - jnp.dot(
                ahat_ref[...], feat_c[...], preferred_element_type=jnp.float32)
            feat_f[...] = new_feat
            feat_c[...] = new_feat.astype(cdt)
            w_k = wrest_ref[pl.ds(pl.multiple_of(s * H, H), H), :]
            out_ref[...] += jnp.dot(new_feat, w_k,
                                    preferred_element_type=jnp.float32)
    else:
        def kernel(feat0_ref, acc0_ref, ahat_ref, wrest_ref, out_ref, feat_f):
            s = pl.program_id(0)

            @pl.when(s == 0)
            def _init():
                out_ref[...] = acc0_ref[...]
                feat_f[...] = feat0_ref[...]

            cur = feat_f[...]
            new_feat = cur - jnp.dot(
                ahat_ref[...], cur, preferred_element_type=jnp.float32)
            feat_f[...] = new_feat
            w_k = wrest_ref[pl.ds(pl.multiple_of(s * H, H), H), :]
            out_ref[...] += jnp.dot(new_feat, w_k,
                                    preferred_element_type=jnp.float32)

    return kernel


def _make_streaming_kernel(H, tm, cdt, K):
    """Ahat streamed as (tm, N) row tiles. grid = (K-1, N/tm), both sequential."""
    use_mirror = cdt != jnp.float32
    last_s = K - 2

    def _body(s, t, feat0_ref, feat0c_ref, acc0_ref, ahat_ref, wrest_ref,
              out_ref, feat_a, feat_b, featc_a, featc_b, acc_ref):
        row0 = pl.multiple_of(t * tm, tm)

        @pl.when(jnp.logical_and(s == 0, t == 0))
        def _init():
            acc_ref[...] = acc0_ref[...]          # b2 + power-0 term folded in
            feat_a[...] = feat0_ref[...]
            if use_mirror:
                featc_a[...] = feat0c_ref[...]

        def lap_step(src_f, src_c, dst_f, dst_c):
            prev_tile = src_f[pl.ds(row0, tm), :]                     # [tm, H] f32
            msg = jnp.dot(ahat_ref[...], src_c[...],                  # [tm, N]@[N, H]
                          preferred_element_type=jnp.float32)
            new_feat = prev_tile - msg
            dst_f[pl.ds(row0, tm), :] = new_feat
            if use_mirror:
                # mirror written tile-by-tile -> no full [N,H] recast per tile
                dst_c[pl.ds(row0, tm), :] = new_feat.astype(cdt)
            w_k = wrest_ref[pl.ds(pl.multiple_of(s * H, H), H), :]
            acc_ref[pl.ds(row0, tm), :] += jnp.dot(
                new_feat, w_k, preferred_element_type=jnp.float32)

        # Ping-pong the resident feature buffers across Laplacian steps.  Both
        # grid axes must stay sequential ("arbitrary"): every tile of step s+1
        # reads ALL rows of feat_s.
        @pl.when(s % 2 == 0)
        def _even():
            lap_step(feat_a, featc_a if use_mirror else feat_a,
                     feat_b, featc_b if use_mirror else feat_b)

        @pl.when(s % 2 == 1)
        def _odd():
            lap_step(feat_b, featc_b if use_mirror else feat_b,
                     feat_a, featc_a if use_mirror else feat_a)

        # Epilogue only on the final step; earlier block writebacks carry stale
        # data but are overwritten by the last (sequential) pass.
        @pl.when(s == last_s)
        def _final():
            out_ref[...] = acc_ref[pl.ds(row0, tm), :]

    if use_mirror:
        def kernel(feat0_ref, feat0c_ref, acc0_ref, ahat_ref, wrest_ref,
                   out_ref, feat_a, feat_b, featc_a, featc_b, acc_ref):
            _body(pl.program_id(0), pl.program_id(1),
                  feat0_ref, feat0c_ref, acc0_ref, ahat_ref, wrest_ref,
                  out_ref, feat_a, feat_b, featc_a, featc_b, acc_ref)
    else:
        def kernel(feat0_ref, acc0_ref, ahat_ref, wrest_ref,
                   out_ref, feat_a, feat_b, acc_ref):
            _body(pl.program_id(0), pl.program_id(1),
                  feat0_ref, None, acc0_ref, ahat_ref, wrest_ref,
                  out_ref, feat_a, feat_b, None, None, acc_ref)

    return kernel


# ---------------------------------------------------------------------------
# Wrapper
# ---------------------------------------------------------------------------
def decoder_forward(x, w1, b1, a, w2, b2, thetas, *,
                    tm=None, use_bf16=True, force_streaming=False):
    N, F = x.shape
    H = w1.shape[1]
    K = len(thetas)
    assert K >= 2, "decoder kernel expects polynomial order d >= 1 (K = d+1 >= 2)"
    assert w2.shape == (K * H, H)
    assert b1.shape == (1, H) and b2.shape == (1, H)

    cdt = jnp.bfloat16 if use_bf16 else jnp.float32
    cb = 2 if use_bf16 else 4
    hi_prec = lax.Precision.HIGHEST

    # ---- fold D^{-1/2} into the adjacency once ------------------------------
    at = a.T                                            # aggregate over in-edges
    deg = jnp.maximum(jnp.sum(a, axis=0), 1.0)          # in-degrees, clamp(min=1)
    dinv = (deg ** -0.5).astype(jnp.float32)
    ahat = (dinv[:, None] * at * dinv[None, :]).astype(cdt)          # [N, N]

    # ---- fold theta-combination + concat + linear2 into per-power weights ---
    theta_arr = jnp.asarray(thetas, dtype=jnp.float32)               # [K, K]
    w_eff = jnp.einsum("ik,ihj->khj", theta_arr, w2.reshape(K, H, H),
                       precision=hi_prec)                            # [K, H, H]
    w_rest = w_eff[1:].reshape((K - 1) * H, H)                       # [(K-1)H, H]

    # ---- prologue in plain XLA (tiny matmuls, overlaps with kernel DMAs) ----
    feat0 = jnp.maximum(jnp.dot(x, w1, precision=hi_prec) + b1, 0.0)
    feat0 = feat0.astype(jnp.float32)                                # [N, H]
    acc0 = (jnp.dot(feat0, w_eff[0], precision=hi_prec) + b2).astype(jnp.float32)
    feat0_c = feat0.astype(cdt)

    budget = _vmem_budget_bytes()
    nh32 = _padded_bytes((N, H), 4)
    nhc = _padded_bytes((N, H), cb)
    wrest_b = _padded_bytes(((K - 1) * H, H), 4)

    # Resident-path footprint (conservatively assumes default double-buffering
    # of every input block, including the constant-index ones).
    resident_est = (2 * _padded_bytes((N, N), cb)        # Ahat
                    + 2 * nh32 * 2                       # feat0 + acc0 inputs
                    + (2 * nhc if use_bf16 else 0)       # feat0_c input
                    + 2 * wrest_b                        # W_eff[1:]
                    + 2 * nh32                           # out block
                    + nh32                               # feat scratch (f32)
                    + (nhc if use_bf16 else 0))          # feat mirror scratch
    resident = (not force_streaming) and resident_est <= budget

    flops = int((K - 1) * (2 * N * N * H + 2 * N * H * H))

    if resident:
        kernel = _make_resident_kernel(H, cdt)

        in_specs = [pl.BlockSpec((N, H), lambda s: (0, 0))]          # feat0
        operands = [feat0]
        if use_bf16:
            in_specs.append(pl.BlockSpec((N, H), lambda s: (0, 0)))  # feat0_c
            operands.append(feat0_c)
        in_specs += [
            pl.BlockSpec((N, H), lambda s: (0, 0)),                  # acc0
            pl.BlockSpec((N, N), lambda s: (0, 0)),                  # Ahat resident
            pl.BlockSpec(((K - 1) * H, H), lambda s: (0, 0)),        # W_eff[1:]
        ]
        operands += [acc0, ahat, w_rest]

        scratch = [pltpu.VMEM((N, H), jnp.float32)]
        if use_bf16:
            scratch.append(pltpu.VMEM((N, H), cdt))

        cost = pl.CostEstimate(
            flops=flops, transcendentals=0,
            bytes_accessed=int(N * N * cb + 4 * N * H * 4
                               + (K - 1) * H * H * 4))

        grid_spec = pltpu.PrefetchScalarGridSpec(
            num_scalar_prefetch=0, grid=(K - 1,),
            in_specs=in_specs,
            out_specs=pl.BlockSpec((N, H), lambda s: (0, 0)),
            scratch_shapes=scratch)

        return pl.pallas_call(
            kernel,
            out_shape=jax.ShapeDtypeStruct((N, H), jnp.float32),
            grid_spec=grid_spec,
            compiler_params=pltpu.CompilerParams(
                dimension_semantics=("arbitrary",),
                vmem_limit_bytes=budget),
            cost_estimate=cost,
        )(*operands)

    # ------------------- streaming fallback (Ahat > VMEM budget) -------------
    def streaming_est(tm_):
        return (2 * _padded_bytes((tm_, N), cb)          # Ahat tile double buffer
                + 2 * nh32 * 2                           # feat0 + acc0 inputs
                + (2 * nhc if use_bf16 else 0)           # feat0_c input
                + 2 * wrest_b
                + 2 * _padded_bytes((tm_, H), 4)         # out block
                + 2 * nh32 + nh32                        # feat_a/feat_b/acc scratch
                + (2 * nhc if use_bf16 else 0))          # mirror scratch

    if tm is None:
        divisors = [c for c in (2048, 1024, 512, 256, 128, 64, 32, 16, 8)
                    if N % c == 0]
        fitting = [c for c in divisors if streaming_est(c) <= budget]
        if fitting:
            tm = fitting[0]
        elif divisors:
            tm = divisors[-1]
        else:
            tm = N
    assert N % tm == 0, "N must be divisible by row-tile size tm"
    assert tm == N or tm % 8 == 0, "tm must be a multiple of 8"
    n_tiles = N // tm

    kernel = _make_streaming_kernel(H, tm, cdt, K)

    in_specs = [pl.BlockSpec((N, H), lambda s, t: (0, 0))]           # feat0
    operands = [feat0]
    if use_bf16:
        in_specs.append(pl.BlockSpec((N, H), lambda s, t: (0, 0)))   # feat0_c
        operands.append(feat0_c)
    in_specs += [
        pl.BlockSpec((N, H), lambda s, t: (0, 0)),                   # acc0
        pl.BlockSpec((tm, N), lambda s, t: (t, 0)),                  # Ahat row tiles
        pl.BlockSpec(((K - 1) * H, H), lambda s, t: (0, 0)),         # W_eff[1:]
    ]
    operands += [acc0, ahat, w_rest]

    scratch = [pltpu.VMEM((N, H), jnp.float32),
               pltpu.VMEM((N, H), jnp.float32)]
    if use_bf16:
        scratch += [pltpu.VMEM((N, H), cdt), pltpu.VMEM((N, H), cdt)]
    scratch += [pltpu.VMEM((N, H), jnp.float32)]

    cost = pl.CostEstimate(
        flops=flops, transcendentals=0,
        bytes_accessed=int((K - 1) * N * N * cb + 4 * N * H * 4
                           + (K - 1) * N * H * 4 + (K - 1) * H * H * 4))

    grid_spec = pltpu.PrefetchScalarGridSpec(
        num_scalar_prefetch=0, grid=(K - 1, n_tiles),
        in_specs=in_specs,
        out_specs=pl.BlockSpec((tm, H), lambda s, t: (t, 0)),
        scratch_shapes=scratch)

    return pl.pallas_call(
        kernel,
        out_shape=jax.ShapeDtypeStruct((N, H), jnp.float32),
        grid_spec=grid_spec,
        compiler_params=pltpu.CompilerParams(
            dimension_semantics=("arbitrary", "arbitrary"),
            vmem_limit_bytes=budget),
        cost_estimate=cost,
    )(*operands)


def decoder_ref(x, w1, b1, at, dinv, w2, b2, thetas):
    """Pure-JAX reference mirroring the PyTorch loop structure (f32)."""
    h = jnp.maximum(x @ w1 + b1, 0.0)
    K = len(thetas)
    pieces = []
    for i in range(K):
        feat = h
        hi = thetas[i][0] * feat
        for k in range(1, K):
            feat = feat - (at @ (feat * dinv)) * dinv
            hi = hi + thetas[i][k] * feat
        pieces.append(hi)
    cat = jnp.concatenate(pieces, axis=-1)
    return cat @ w2 + b2


if __name__ == "__main__":
    d = 2
    thetas = calculate_theta2(d)
    K = len(thetas)                     # 3 PolyConv branches
    in_feats, h_feats = 16, 32

    def make_inputs(N, seed=0):
        key = jax.random.PRNGKey(seed)
        k_x, k_a, k_w1, k_b1, k_w2, k_b2 = jax.random.split(key, 6)
        x = jax.random.normal(k_x, (N, in_feats), dtype=jnp.float32)
        # deterministic random undirected graph (symmetric 0/1, no self-loops)
        a_rand = (jax.random.uniform(k_a, (N, N)) < 0.1).astype(jnp.float32)
        a = jnp.triu(a_rand, k=1)
        a = a + a.T
        w1 = jax.random.normal(k_w1, (in_feats, h_feats), jnp.float32) / math.sqrt(in_feats)
        b1 = jax.random.normal(k_b1, (1, h_feats), jnp.float32) * 0.01
        w2 = jax.random.normal(k_w2, (h_feats * K, h_feats), jnp.float32) / math.sqrt(h_feats * K)
        b2 = jax.random.normal(k_b2, (1, h_feats), jnp.float32) * 0.01
        return x, a, w1, b1, w2, b2

    def check(N, *, tm=None, use_bf16, force_streaming=False, atol, rtol, fro_tol):
        x, a, w1, b1, w2, b2 = make_inputs(N)
        out = decoder_forward(x, w1, b1, a, w2, b2, thetas, tm=tm,
                              use_bf16=use_bf16, force_streaming=force_streaming)
        out = jax.block_until_ready(out)

        at = a.T
        deg = jnp.maximum(jnp.sum(a, axis=0), 1.0)
        dinv = (deg ** -0.5).reshape(N, 1).astype(jnp.float32)
        ref = decoder_ref(x, w1, b1, at, dinv, w2, b2, thetas)

        assert out.shape == (N, h_feats)
        max_err = float(jnp.max(jnp.abs(out - ref)))
        fro = float(jnp.linalg.norm(out - ref) / jnp.linalg.norm(ref))
        ok = bool(jnp.allclose(out, ref, atol=atol, rtol=rtol)) and fro < fro_tol
        assert ok, (f"mismatch N={N} tm={tm} bf16={use_bf16} "
                    f"stream={force_streaming}: max|err|={max_err:.3e} fro={fro:.3e}")

    # f32 end-to-end (exact path): resident-Ahat and streaming fallback
    check(N=64, use_bf16=False, atol=1e-4, rtol=1e-4, fro_tol=1e-4)
    check(N=256, tm=128, use_bf16=False, force_streaming=True,
          atol=1e-4, rtol=1e-4, fro_tol=1e-4)
    # bf16 matmul operands (f32 recurrence state + accumulation), both paths
    check(N=256, use_bf16=True, atol=1e-1, rtol=1e-1, fro_tol=2e-2)
    check(N=256, tm=128, use_bf16=True, force_streaming=True,
          atol=1e-1, rtol=1e-1, fro_tol=2e-2)

    print("KERNEL_OK")
</pallas_src>

<mosaic_0001>
module attributes {stable_mosaic.version = 11 : i64} {
  func.func @kernel(%arg0: i32, %arg1: memref<64x32xf32, #tpu.memory_space<vmem>>, %arg2: memref<64x32xf32, #tpu.memory_space<vmem>>, %arg3: memref<64x64xf32, #tpu.memory_space<vmem>>, %arg4: memref<64x32xf32, #tpu.memory_space<vmem>>, %arg5: memref<64x32xf32, #tpu.memory_space<vmem>>, %arg6: memref<64x32xf32, #tpu.memory_space<vmem>>) attributes {dimension_semantics = [#tpu.dimension_semantics<arbitrary>], iteration_bounds = array<i64: 2>, scalar_prefetch = 0 : i64, scratch_operands = 1 : i64, tpu.core_type = #tpu.core_type<tc>, window_params = [{pipeline_mode = #tpu.pipeline_mode<synchronous>, transform_indices = @transform_0, window_bounds = array<i64: 64, 32>}, {pipeline_mode = #tpu.pipeline_mode<synchronous>, transform_indices = @transform_1, window_bounds = array<i64: 64, 32>}, {pipeline_mode = #tpu.pipeline_mode<synchronous>, transform_indices = @transform_2, window_bounds = array<i64: 64, 64>}, {pipeline_mode = #tpu.pipeline_mode<synchronous>, transform_indices = @transform_3, window_bounds = array<i64: 64, 32>}, {pipeline_mode = #tpu.pipeline_mode<synchronous>, transform_indices = @transform_4, window_bounds = array<i64: 64, 32>}]} {
    %c0_i32 = arith.constant 0 : i32
    %0 = arith.cmpi eq, %arg0, %c0_i32 : i32
    %1 = arith.extui %0 : i1 to i32
    %c0_i32_0 = arith.constant 0 : i32
    %2 = arith.cmpi ne, %1, %c0_i32_0 : i32
    scf.if %2 {
      %c0_12 = arith.constant 0 : index
      %c0_13 = arith.constant 0 : index
      %16 = vector.load %arg2[%c0_12, %c0_13] : memref<64x32xf32, #tpu.memory_space<vmem>>, vector<64x32xf32>
      %c0_14 = arith.constant 0 : index
      %c0_15 = arith.constant 0 : index
      %17 = vector.load %arg5[%c0_14, %c0_15] : memref<64x32xf32, #tpu.memory_space<vmem>>, vector<64x32xf32>
      tpu.vector_store %arg5[%c0_14, %c0_15], %16 {strides = array<i32>} : memref<64x32xf32, #tpu.memory_space<vmem>>, vector<64x32xf32>,
      %c0_16 = arith.constant 0 : index
      %c0_17 = arith.constant 0 : index
      %18 = vector.load %arg1[%c0_16, %c0_17] : memref<64x32xf32, #tpu.memory_space<vmem>>, vector<64x32xf32>
      %c0_18 = arith.constant 0 : index
      %c0_19 = arith.constant 0 : index
      %19 = vector.load %arg6[%c0_18, %c0_19] : memref<64x32xf32, #tpu.memory_space<vmem>>, vector<64x32xf32>
      tpu.vector_store %arg6[%c0_18, %c0_19], %18 {strides = array<i32>} : memref<64x32xf32, #tpu.memory_space<vmem>>, vector<64x32xf32>,
    } else {
    }
    %c0 = arith.constant 0 : index
    %c0_1 = arith.constant 0 : index
    %3 = vector.load %arg6[%c0, %c0_1] : memref<64x32xf32, #tpu.memory_space<vmem>>, vector<64x32xf32>
    %c0_2 = arith.constant 0 : index
    %c0_3 = arith.constant 0 : index
    %4 = vector.load %arg3[%c0_2, %c0_3] : memref<64x64xf32, #tpu.memory_space<vmem>>, vector<64x64xf32>
    %cst = arith.constant dense<0.000000e+00> : vector<64x32xf32>
    %5 = tpu.matmul %4, %3, %cst {dimension_numbers = #tpu.dot_dimension_numbers<[1], [0], [0], [1], [0, 0, 1, 1], [], []>} : vector<64x64xf32>, vector<64x32xf32>, vector<64x32xf32> -> vector<64x32xf32>
    %6 = arith.subf %3, %5 : vector<64x32xf32>
    %c0_4 = arith.constant 0 : index
    %c0_5 = arith.constant 0 : index
    %7 = vector.load %arg6[%c0_4, %c0_5] : memref<64x32xf32, #tpu.memory_space<vmem>>, vector<64x32xf32>
    tpu.vector_store %arg6[%c0_4, %c0_5], %6 {strides = array<i32>} : memref<64x32xf32, #tpu.memory_space<vmem>>, vector<64x32xf32>,
    %c32_i32 = arith.constant 32 : i32
    %8 = arith.muli %arg0, %c32_i32 : i32
    %9 = tpu.assume_multiple %8, 32 : i32
    %10 = arith.index_cast %9 : i32 to index
    %c0_6 = arith.constant 0 : index
    %11 = vector.load %arg4[%10, %c0_6] : memref<64x32xf32, #tpu.memory_space<vmem>>, vector<32x32xf32>
    %c0_7 = arith.constant 0 : index
    %c0_8 = arith.constant 0 : index
    %12 = vector.load %arg5[%c0_7, %c0_8] : memref<64x32xf32, #tpu.memory_space<vmem>>, vector<64x32xf32>
    %cst_9 = arith.constant dense<0.000000e+00> : vector<64x32xf32>
    %13 = tpu.matmul %6, %11, %cst_9 {dimension_numbers = #tpu.dot_dimension_numbers<[1], [0], [0], [1], [0, 0, 1, 1], [], []>} : vector<64x32xf32>, vector<32x32xf32>, vector<64x32xf32> -> vector<64x32xf32>
    %14 = arith.addf %12, %13 : vector<64x32xf32>
    %c0_10 = arith.constant 0 : index
    %c0_11 = arith.constant 0 : index
    %15 = vector.load %arg5[%c0_10, %c0_11] : memref<64x32xf32, #tpu.memory_space<vmem>>, vector<64x32xf32>
    tpu.vector_store %arg5[%c0_10, %c0_11], %14 {strides = array<i32>} : memref<64x32xf32, #tpu.memory_space<vmem>>, vector<64x32xf32>,
    return
  }
  func.func @transform_0(%arg0: i32) -> (i32, i32) {
    %c0_i32 = arith.constant 0 : i32
    %c0_i32_0 = arith.constant 0 : i32
    %c0_i32_1 = arith.constant 0 : i32
    return %c0_i32, %c0_i32_0 : i32, i32
  }
  func.func @transform_1(%arg0: i32) -> (i32, i32) {
    %c0_i32 = arith.constant 0 : i32
    %c0_i32_0 = arith.constant 0 : i32
    %c0_i32_1 = arith.constant 0 : i32
    return %c0_i32, %c0_i32_0 : i32, i32
  }
  func.func @transform_2(%arg0: i32) -> (i32, i32) {
    %c0_i32 = arith.constant 0 : i32
    %c0_i32_0 = arith.constant 0 : i32
    %c0_i32_1 = arith.constant 0 : i32
    return %c0_i32, %c0_i32_0 : i32, i32
  }
  func.func @transform_3(%arg0: i32) -> (i32, i32) {
    %c0_i32 = arith.constant 0 : i32
    %c0_i32_0 = arith.constant 0 : i32
    %c0_i32_1 = arith.constant 0 : i32
    return %c0_i32, %c0_i32_0 : i32, i32
  }
  func.func @transform_4(%arg0: i32) -> (i32, i32) {
    %c0_i32 = arith.constant 0 : i32
    %c0_i32_0 = arith.constant 0 : i32
    %c0_i32_1 = arith.constant 0 : i32
    return %c0_i32, %c0_i32_0 : i32, i32
  }
}

</mosaic_0001>

<bundles_post_ra>
// kernel: tpu_custom_call.1
= control target key start
LH: loop header
LB: loop body
LE: loop exit
PB: predicated region body
PF: predicated region fallthrough
CT: control target
= control target key end

     0   :  { %s704_s15 = smov 0   ;;  %s920_s0 = inlined_call_operand.vmem [shape: f32[64,32], index: 0, kind: input, shape index: {}]   ;;  %s921_s1 = inlined_call_operand.vmem [shape: f32[64,32], index: 1, kind: input, shape index: {}]   ;;  %s922_s2 = inlined_call_operand.vmem [shape: f32[64,64], index: 2, kind: input, shape index: {}]   ;;  %s923_s3 = inlined_call_operand.vmem [shape: f32[64,32], index: 3, kind: input, shape index: {}]   ;;  %s924_s4 = inlined_call_operand.vmem [shape: f32[64,32], index: 4, kind: output, shape index: {}]  }
   0x1 LB: > { %s540_s16 = sadd.s32 4294967295, %s677_s15   ;;  %p542_p0 = scmp.ge.s32.totalorder %s677_s15, 1  ;;  %s677_s15 = sphi %s704_s15, %s14_s15  }
   0x2   : > { %p147_p1 = scmp.lt.s32.totalorder %s677_s15, 3 }
   0x4   : > { %p148_p2 = pnand %p542_p0, %p147_p1 }
   0x5   : > { %p543_p3 = scmp.ne.s32.totalorder (!%p148_p2), %s540_s16, 0 }
   0x6   : > { %151 = sbr.rel (%p148_p2) target bundleno = 490 (0x1ea), region = 36 }
   0xd   : > { %166 = sbr.rel (%p543_p3) target bundleno = 22 (0x16), region = 40  ;;  %v167_v0 = vld [vmem:[%s921_s1] sm:$0xff] (!%p543_p3)  ;;  %vm175_vm0 = vcmask (!%p543_p3), 261120   ;;  %v168_v1 = vld [vmem:[%s921_s1 + $0x8] sm:$0xff] (!%p543_p3)  ;;  %v169_v2 = vld [vmem:[%s921_s1 + $0x10] sm:$0xff] (!%p543_p3) }
   0xe   : > { %176 = vst.msk [vmem:[%s924_s4] sm:$0xff] (!%p543_p3), %vm175_vm0, %v167_v0  ;;  %177 = vst.msk [vmem:[%s924_s4 + $0x8] sm:$0xff] (!%p543_p3), %vm175_vm0, %v168_v1  ;;  %v170_v3 = vld [vmem:[%s921_s1 + $0x18] sm:$0xff] (!%p543_p3)  ;;  %v171_v4 = vld [vmem:[%s921_s1 + $0x20] sm:$0xff] (!%p543_p3) }
   0xf   : > { %178 = vst.msk [vmem:[%s924_s4 + $0x10] sm:$0xff] (!%p543_p3), %vm175_vm0, %v169_v2  ;;  %v172_v5 = vld [vmem:[%s921_s1 + $0x28] sm:$0xff] (!%p543_p3)  ;;  %179 = vst.msk [vmem:[%s924_s4 + $0x18] sm:$0xff] (!%p543_p3), %vm175_vm0, %v170_v3  ;;  %v173_v6 = vld [vmem:[%s921_s1 + $0x30] sm:$0xff] (!%p543_p3) }
  0x10   : > { %180 = vst.msk [vmem:[%s924_s4 + $0x20] sm:$0xff] (!%p543_p3), %vm175_vm0, %v171_v4  ;;  %181 = vst.msk [vmem:[%s924_s4 + $0x28] sm:$0xff] (!%p543_p3), %vm175_vm0, %v172_v5  ;;  %v174_v7 = vld [vmem:[%s921_s1 + $0x38] sm:$0xff] (!%p543_p3)  ;;  %v184_v8 = vld [vmem:[%s920_s0] sm:$0xff] (!%p543_p3) }
  0x11   : > { %182 = vst.msk [vmem:[%s924_s4 + $0x30] sm:$0xff] (!%p543_p3), %vm175_vm0, %v173_v6  ;;  %183 = vst.msk [vmem:[%s924_s4 + $0x38] sm:$0xff] (!%p543_p3), %vm175_vm0, %v174_v7  ;;  %v185_v9 = vld [vmem:[%s920_s0 + $0x8] sm:$0xff] (!%p543_p3)  ;;  %v186_v10 = vld [vmem:[%s920_s0 + $0x10] sm:$0xff] (!%p543_p3) }
  0x12   : > { %192 = vst.msk [vmem:[#allocation2] sm:$0xff] (!%p543_p3), %vm175_vm0, %v184_v8  ;;  %v187_v11 = vld [vmem:[%s920_s0 + $0x18] sm:$0xff] (!%p543_p3)  ;;  %193 = vst.msk [vmem:[#allocation2 + $0x8] sm:$0xff] (!%p543_p3), %vm175_vm0, %v185_v9  ;;  %v188_v12 = vld [vmem:[%s920_s0 + $0x20] sm:$0xff] (!%p543_p3) }
  0x13   : > { %194 = vst.msk [vmem:[#allocation2 + $0x10] sm:$0xff] (!%p543_p3), %vm175_vm0, %v186_v10  ;;  %195 = vst.msk [vmem:[#allocation2 + $0x18] sm:$0xff] (!%p543_p3), %vm175_vm0, %v187_v11  ;;  %v189_v13 = vld [vmem:[%s920_s0 + $0x28] sm:$0xff] (!%p543_p3)  ;;  %v190_v14 = vld [vmem:[%s920_s0 + $0x30] sm:$0xff] (!%p543_p3) }
  0x14   : > { %196 = vst.msk [vmem:[#allocation2 + $0x20] sm:$0xff] %vm175_vm0, %v188_v12  ;;  %197 = vst.msk [vmem:[#allocation2 + $0x28] sm:$0xff] %vm175_vm0, %v189_v13  ;;  %v191_v15 = vld [vmem:[%s920_s0 + $0x38] sm:$0xff] }
  0x15   : > { %198 = vst.msk [vmem:[#allocation2 + $0x30] sm:$0xff] %vm175_vm0, %v190_v14  ;;  %199 = vst.msk [vmem:[#allocation2 + $0x38] sm:$0xff] %vm175_vm0, %v191_v15 }
  0x16 PF: > { %vm216_vm1 = vcmask 523264   ;;  %s552_s17 = sshll.u32 %s540_s16, 5  ;;  %v208_v24 = vld [vmem:[%s922_s2] sm:$0xff]  ;;  %v209_v32 = vld [vmem:[%s922_s2 + $0x8] sm:$0xff]  ;;  %v210_v33 = vld [vmem:[%s922_s2 + $0x10] sm:$0xff]  ;;  %vm354_vm2 = vcmask 261120  }
  0x17   : > { %s810_s22 = scalar_lea.vmem %s923_s3, %s552_s17  ;;  %607 = vmatprep.mubr.msk.f32.mxu0 %vm216_vm1, %v208_v24  ;;  %v211_v34 = vld [vmem:[%s922_s2 + $0x18] sm:$0xff]  ;;  %v212_v35 = vld [vmem:[%s922_s2 + $0x20] sm:$0xff]  ;;  %v213_v36 = vld [vmem:[%s922_s2 + $0x28] sm:$0xff] }
  0x18   : > { %v365_v26 = vld [vmem:[%s810_s22] sm:$0xff]  ;;  %v366_v27 = vld [vmem:[%s810_s22 + $0x8] sm:$0xff]  ;;  %v214_v37 = vld [vmem:[%s922_s2 + $0x30] sm:$0xff] }
  0x19   : > { %v655_v30 = vpack.c.bf16 %v366_v27, %v365_v26  ;;  %v215_v38 = vld [vmem:[%s922_s2 + $0x38] sm:$0xff]  ;;  %v367_v39 = vld [vmem:[%s810_s22 + $0x10] sm:$0xff]  ;;  %v370_v58 = vld [vmem:[%s924_s4 + $0x8] sm:$0xff] }
  0x1a   : > { %v368_v40 = vld [vmem:[%s810_s22 + $0x18] sm:$0xff]  ;;  %v369_v59 = vld [vmem:[%s924_s4] sm:$0xff]  ;;  %v371_v1 = vld [vmem:[%s924_s4 + $0x10] sm:$0xff] }
  0x1b   : > { %v200_v16 = vld [vmem:[#allocation2] sm:$0xff]  ;;  %v201_v17 = vld [vmem:[#allocation2 + $0x8] sm:$0xff]  ;;  %656 = vmatprep.subr.bf16.mxu1 %v655_v30  ;;  %v659_v41 = vpack.c.bf16 %v368_v40, %v367_v39  ;;  %v372_v0 = vld [vmem:[%s924_s4 + $0x18] sm:$0xff] }
  0x1c   : > { %v202_v18 = vld [vmem:[#allocation2 + $0x10] sm:$0xff]  ;;  %v639_v19 = vpack.c.bf16 %v201_v17, %v200_v16  ;;  %v203_v20 = vld [vmem:[#allocation2 + $0x18] sm:$0xff]  ;;  %658 = vmatpush3.bf16.msra.mxu1 %v655_v30  ;;  %v374_v6 = vld [vmem:[%s924_s4 + $0x28] sm:$0xff] }
  0x1d   : > { %v643_v21 = vpack.c.bf16 %v203_v20, %v202_v18  ;;  %v204_v22 = vld [vmem:[#allocation2 + $0x20] sm:$0xff]  ;;  %v205_v23 = vld [vmem:[#allocation2 + $0x28] sm:$0xff]  ;;  %v206_v28 = vld [vmem:[#allocation2 + $0x30] sm:$0xff]  ;;  %660 = vmatprep.subr.bf16.mxu1 %v659_v41 }
  0x1e   : > { %640 = vmatprep.subr.bf16.mxu0 %v639_v19  ;;  %v647_v25 = vpack.c.bf16 %v205_v23, %v204_v22  ;;  %v207_v29 = vld [vmem:[#allocation2 + $0x38] sm:$0xff]  ;;  %v373_v7 = vld [vmem:[%s924_s4 + $0x20] sm:$0xff]  ;;  %v375_v13 = vld [vmem:[%s924_s4 + $0x30] sm:$0xff] }
  0x1f   : > { %642 = vmatpush3.bf16.msra.mxu0 %v639_v19  ;;  %v651_v31 = vpack.c.bf16 %v207_v29, %v206_v28  ;;  %v376_v12 = vld [vmem:[%s924_s4 + $0x38] sm:$0xff] }
  0x20   : > { %644 = vmatprep.subr.bf16.mxu0 %v643_v21  ;;  %662 = vmatpush3.bf16.msra.mxu1 %v659_v41 }
  0x23   : > { %646 = vmatpush3.bf16.msra.mxu0 %v643_v21 }
  0x24   : > { %648 = vmatprep.subr.bf16.mxu0 %v647_v25 }
  0x27   : > { %650 = vmatpush3.bf16.msra.mxu0 %v647_v25 }
  0x28   : > { %652 = vmatprep.subr.bf16.mxu0 %v651_v31 }
  0x2b   : > { %654 = vmatpush3.bf16.msra.mxu0 %v651_v31 }
  0x2e   : > { %608 = vmatmul.mubr.msk.f32.vlgmr.msra.gmra.mrb[0].mxu0 %vm216_vm1, %v209_v32 }
  0x2f   : > { %610 = vmatprep.mubr.msk.f32.mxu0 %vm216_vm1, %v210_v33 }
  0x32   : > { %611 = vmatmul.mubr.msk.f32.gmra.mrb[2].mxu0 %vm216_vm1, %v211_v34 }
  0x33   : > { %613 = vmatprep.mubr.msk.f32.mxu0 %vm216_vm1, %v212_v35 }
  0x36   : > { %614 = vmatmul.mubr.msk.f32.gmra.mrb[4].mxu0 %vm216_vm1, %v213_v36 }
  0x37   : > { %616 = vmatprep.mubr.msk.f32.mxu0 %vm216_vm1, %v214_v37 }
  0x3a   : > { %617 = vmatmul.mubr.msk.f32.gmra.mrb[6].mxu0 %vm216_vm1, %v215_v38 }
 0x101   : > { %v609_v42 = vpop.f32.mrb[0].mxu0 }
 0x102   : > { %v347_v43 = vsub.f32 %v201_v17, %v609_v42  ;;  %v307_v44 = vpop.f32.mrb[1].mxu0 }
 0x103   : > { %v346_v45 = vsub.f32 %v200_v16, %v307_v44 }
 0x104   : > { %356 = vst.msk [vmem:[#allocation2 + $0x8] sm:$0xff] %vm354_vm2, %v347_v43 }
 0x105   : > { %355 = vst.msk [vmem:[#allocation2] sm:$0xff] %vm354_vm2, %v346_v45  ;;  %v612_v46 = vpop.f32.mrb[2].mxu0  ;;  %627 = vmatprep.mubr.msk.f32.mxu1 %vm354_vm2, %v346_v45 }
 0x106   : > { %v349_v47 = vsub.f32 %v203_v20, %v612_v46  ;;  %v317_v48 = vpop.f32.mrb[3].mxu0  ;;  %628 = vmatmul.mubr.msk.f32.vlgmr.msra.gmra.mrb[0].mxu1 %vm354_vm2, %v347_v43 }
 0x107   : > { %v348_v49 = vsub.f32 %v202_v18, %v317_v48 }
 0x108   : > { %358 = vst.msk [vmem:[#allocation2 + $0x18] sm:$0xff] %vm354_vm2, %v349_v47 }
 0x109   : > { %357 = vst.msk [vmem:[#allocation2 + $0x10] sm:$0xff] %vm354_vm2, %v348_v49  ;;  %v615_v50 = vpop.f32.mrb[4].mxu0  ;;  %630 = vmatprep.mubr.msk.f32.mxu1 %vm354_vm2, %v348_v49 }
 0x10a   : > { %v351_v51 = vsub.f32 %v205_v23, %v615_v50  ;;  %v327_v52 = vpop.f32.mrb[5].mxu0  ;;  %631 = vmatmul.mubr.msk.f32.gmra.mrb[2].mxu1 %vm354_vm2, %v349_v47 }
 0x10b   : > { %v350_v53 = vsub.f32 %v204_v22, %v327_v52 }
 0x10c   : > { %360 = vst.msk [vmem:[#allocation2 + $0x28] sm:$0xff] %vm354_vm2, %v351_v51 }
 0x10d   : > { %359 = vst.msk [vmem:[#allocation2 + $0x20] sm:$0xff] %vm354_vm2, %v350_v53  ;;  %v618_v54 = vpop.f32.mrb[6].mxu0  ;;  %633 = vmatprep.mubr.msk.f32.mxu1 %vm354_vm2, %v350_v53 }
 0x10e   : > { %v353_v55 = vsub.f32 %v207_v29, %v618_v54  ;;  %v337_v56 = vpop.f32.mrb[7].mxu0  ;;  %634 = vmatmul.mubr.msk.f32.gmra.mrb[4].mxu1 %vm354_vm2, %v351_v51 }
 0x10f   : > { %v352_v57 = vsub.f32 %v206_v28, %v337_v56 }
 0x110   : > { %362 = vst.msk [vmem:[#allocation2 + $0x38] sm:$0xff] %vm354_vm2, %v353_v55 }
 0x111   : > { %361 = vst.msk [vmem:[#allocation2 + $0x30] sm:$0xff] %vm354_vm2, %v352_v57  ;;  %636 = vmatprep.mubr.msk.f32.mxu1 %vm354_vm2, %v352_v57 }
 0x112   : > { %637 = vmatmul.mubr.msk.f32.gmra.mrb[6].mxu1 %vm354_vm2, %v353_v55 }
 0x1d9   : > { %v629_v60 = vpop.f32.mrb[0].mxu1 }
 0x1da   : > { %v507_v61 = vadd.f32 %v629_v60, %v370_v58  ;;  %v467_v62 = vpop.f32.mrb[1].mxu1 }
 0x1db   : > { %v506_v63 = vadd.f32 %v467_v62, %v369_v59 }
 0x1dc   : > { %515 = vst.msk [vmem:[%s924_s4 + $0x8] sm:$0xff] %vm354_vm2, %v507_v61 }
 0x1dd   : > { %514 = vst.msk [vmem:[%s924_s4] sm:$0xff] %vm354_vm2, %v506_v63  ;;  %v632_v2 = vpop.f32.mrb[2].mxu1 }
 0x1de   : > { %v509_v3 = vadd.f32 %v632_v2, %v372_v0  ;;  %v477_v4 = vpop.f32.mrb[3].mxu1 }
 0x1df   : > { %v508_v5 = vadd.f32 %v477_v4, %v371_v1 }
 0x1e0   : > { %517 = vst.msk [vmem:[%s924_s4 + $0x18] sm:$0xff] %vm354_vm2, %v509_v3 }
 0x1e1   : > { %516 = vst.msk [vmem:[%s924_s4 + $0x10] sm:$0xff] %vm354_vm2, %v508_v5  ;;  %v635_v8 = vpop.f32.mrb[4].mxu1 }
 0x1e2   : > { %v511_v9 = vadd.f32 %v635_v8, %v374_v6  ;;  %v487_v10 = vpop.f32.mrb[5].mxu1 }
 0x1e3   : > { %v510_v11 = vadd.f32 %v487_v10, %v373_v7 }
 0x1e4   : > { %519 = vst.msk [vmem:[%s924_s4 + $0x28] sm:$0xff] %vm354_vm2, %v511_v9 }
 0x1e5   : > { %518 = vst.msk [vmem:[%s924_s4 + $0x20] sm:$0xff] %vm354_vm2, %v510_v11  ;;  %v638_v14 = vpop.f32.mrb[6].mxu1 }
 0x1e6   : > { %v513_v15 = vadd.f32 %v638_v14, %v376_v12  ;;  %v497_v16 = vpop.f32.mrb[7].mxu1 }
 0x1e7   : > { %v512_v17 = vadd.f32 %v497_v16, %v375_v13 }
 0x1e8   : > { %521 = vst.msk [vmem:[%s924_s4 + $0x38] sm:$0xff] %vm354_vm2, %v513_v15 }
 0x1e9   : > { %520 = vst.msk [vmem:[%s924_s4 + $0x30] sm:$0xff] %vm354_vm2, %v512_v17 }
 0x1ea PF: > { %s14_s15 = sadd.s32 1, %s677_s15  }
 0x1eb   : > { %p11_p4 = scmp.ge.s32.totalorder %s14_s15, 4  }
 0x1ed   :  { %13 = sbr.rel (!%p11_p4) target bundleno = 1 (0x1), region = 64 }

</bundles_post_ra>
